<compile_context>
chip_gen: v7x
topology: tpu7x:2x2x1
jax: 0.10.0
libtpu: 0.0.40
codegen_flags: <defaults>
</compile_context>

<pallas_src>
import functools

import jax
import jax.numpy as jnp
from jax.experimental import pallas as pl
from jax.experimental.pallas import tpu as pltpu


# ----------------------------------------------------------------------------
# Parameter setup (glue, plain JAX) -- mirrors dct2_fft2.precompute_expk
# ----------------------------------------------------------------------------
def precompute_expk(n, dtype=jnp.float32):
    """expk[k] = (cos(pi*k/(2n)), sin(pi*k/(2n))), shape (n, 2)."""
    ang = jnp.arange(n, dtype=dtype) * (jnp.pi / (2.0 * n))
    return jnp.stack([jnp.cos(ang), jnp.sin(ang)], axis=-1)


def _idct_basis_from_expk(M, expkM):
    """C_M[u, p] = cos(pi*p*(2u+1)/(2M)) via angle addition (built in f32)."""
    expkM = expkM.astype(jnp.float32)
    u = jnp.arange(M, dtype=jnp.float32)
    p = jnp.arange(M, dtype=jnp.float32)
    ang = (jnp.pi / M) * (u[:, None] * p[None, :])
    return jnp.cos(ang) * expkM[None, :, 0] - jnp.sin(ang) * expkM[None, :, 1]


def _idxst_basis_from_expk(N, expkN):
    """S_N[q, v] = sin(pi*q*(2v+1)/(2N)) via angle addition (built in f32)."""
    expkN = expkN.astype(jnp.float32)
    v = jnp.arange(N, dtype=jnp.float32)
    q = jnp.arange(N, dtype=jnp.float32)
    ang = (jnp.pi / N) * (q[:, None] * v[None, :])
    return jnp.sin(ang) * expkN[:, 0:1] + jnp.cos(ang) * expkN[:, 1:2]


# Bases cached per (M, N, operand dtype) -- module-init style, like DREAMPlace's
# precomputed expk.  When expk tables are supplied, the cache is additionally
# keyed on their ids (the nn.Module caller keeps the same arrays alive).
_BASIS_CACHE = {}


def _get_bases(M, N, operand_dtype, expkM=None, expkN=None):
    op_name = jnp.dtype(operand_dtype).name
    if expkM is None and expkN is None:
        key = (int(M), int(N), op_name)
    else:
        key = (int(M), int(N), op_name, id(expkM), id(expkN))
    hit = _BASIS_CACHE.get(key)
    if hit is not None:
        return hit
    ekM = precompute_expk(M, jnp.float32) if expkM is None else expkM
    ekN = precompute_expk(N, jnp.float32) if expkN is None else expkN
    cm = jax.device_put(_idct_basis_from_expk(M, ekM).astype(operand_dtype))
    sn = jax.device_put(_idxst_basis_from_expk(N, ekN).astype(operand_dtype))
    _BASIS_CACHE[key] = (cm, sn)
    return cm, sn


# ----------------------------------------------------------------------------
# Device capability (memoized)
# ----------------------------------------------------------------------------
_VMEM_CAP = None


def _vmem_cap_bytes():
    """Per-TensorCore scoped-VMEM cap: 7/8 of physical, clamped to 112 MiB.

    v7x (64 MiB physical) -> 56 MiB; v5e/v6e (128 MiB) -> 112 MiB.
    """
    global _VMEM_CAP
    if _VMEM_CAP is None:
        try:
            phys = int(pltpu.get_tpu_info().vmem_capacity_bytes)
        except Exception:
            phys = 64 * 1024 * 1024  # conservative default (v7x per-TC size)
        _VMEM_CAP = min(phys * 7 // 8, 112 * 1024 * 1024)
    return _VMEM_CAP


_BUFFERED1_OK = None


def _buffered1_supported():
    """One-time memoized probe: can a constant-index input be single-buffered?"""
    global _BUFFERED1_OK
    if _BUFFERED1_OK is None:
        try:
            def _probe(x_ref, o_ref):
                o_ref[...] = x_ref[...] + 1.0

            f = pl.pallas_call(
                _probe,
                out_shape=jax.ShapeDtypeStruct((8, 128), jnp.float32),
                grid=(2,),
                in_specs=[pl.BlockSpec((8, 128), lambda i: (0, 0),
                                       pipeline_mode=pl.Buffered(1))],
                out_specs=pl.BlockSpec((8, 128), lambda i: (0, 0)),
            )
            jax.block_until_ready(f(jnp.zeros((8, 128), jnp.float32)))
            _BUFFERED1_OK = True
        except Exception:
            _BUFFERED1_OK = False
    return _BUFFERED1_OK


# ----------------------------------------------------------------------------
# Single-pass (resident) path: grid over row tiles only.
# ----------------------------------------------------------------------------
_MM_TILES = (512, 256, 128, 64, 32, 16, 8)


def _single_pass_tm(M, N, op_sz, out_sz, budget, x_sn_bufs):
    """Largest MXU-aligned row tile whose resident footprint fits `budget`.

    Prefers >=2 (and an even number of) row steps so the "parallel" grid axis
    shards evenly across v7x's two TensorCores; on single-TC chips the only
    cost of the extra steps is ~0.35us each (x / S_N are resident, so no HBM
    re-fetch is incurred by more row passes).
    """
    resident = x_sn_bufs * (M * N + N * N) * op_sz
    cands = [t for t in _MM_TILES if M % t == 0] or [M]

    def footprint(tm):
        return (resident
                + 2 * tm * M * op_sz      # C_M row tile (double-buffered)
                + 2 * tm * N * out_sz     # output row slab (double-buffered)
                + tm * N * 4              # f32 row-transform intermediate
                + tm * N * op_sz)         # its one-time MXU-operand cast

    fitting = [t for t in cands if footprint(t) <= budget]
    if not fitting:
        return None
    for t in fitting:
        if M // t >= 2 and (M // t) % 2 == 0:
            return t
    for t in fitting:
        if M // t >= 2:
            return t
    return fitting[0]


@functools.lru_cache(maxsize=None)
def _build_single_pass(M, N, tm, op_name, out_name, single_buf, precision):
    op_dtype = jnp.dtype(op_name)
    out_dtype = jnp.dtype(out_name)
    op_sz, out_sz = op_dtype.itemsize, out_dtype.itemsize

    def kernel(cm_ref, x_ref, sn_ref, out_ref):
        # Row transform (IDCT along M), f32 accumulation on the MXU.
        tmp = jnp.dot(cm_ref[...], x_ref[...],
                      preferred_element_type=jnp.float32, precision=precision)
        # Column transform (IDXST along N).  Cast the row transform to the MXU
        # operand dtype exactly once per row tile (no-op for f32 operands).
        out_ref[...] = jnp.dot(tmp.astype(op_dtype), sn_ref[...],
                               preferred_element_type=jnp.float32,
                               precision=precision).astype(out_dtype)

    resident_kwargs = {"pipeline_mode": pl.Buffered(1)} if single_buf else {}
    x_spec = pl.BlockSpec((M, N), lambda i: (0, 0), **resident_kwargs)
    sn_spec = pl.BlockSpec((N, N), lambda i: (0, 0), **resident_kwargs)

    bufs = 1 if single_buf else 2
    footprint = (bufs * (M * N + N * N) * op_sz + 2 * tm * M * op_sz
                 + 2 * tm * N * out_sz + tm * N * (4 + op_sz))
    vmem_limit = min(_vmem_cap_bytes(), max(footprint + (8 << 20), 32 << 20))

    # x and S_N are resident (fetched once), so this is the true HBM traffic.
    cost = pl.CostEstimate(
        flops=2 * M * M * N + 2 * M * N * N,
        transcendentals=0,
        bytes_accessed=op_sz * (M * M + M * N + N * N) + out_sz * M * N)

    call = pl.pallas_call(
        kernel,
        out_shape=jax.ShapeDtypeStruct((M, N), out_dtype),
        grid_spec=pltpu.PrefetchScalarGridSpec(
            num_scalar_prefetch=0,
            grid=(M // tm,),
            in_specs=[pl.BlockSpec((tm, M), lambda i: (i, 0)),  # C_M row tile
                      x_spec,                                   # full x, resident
                      sn_spec],                                 # full S_N, resident
            out_specs=pl.BlockSpec((tm, N), lambda i: (i, 0)),  # lane-dense slab
        ),
        compiler_params=pltpu.CompilerParams(
            dimension_semantics=("parallel",),
            vmem_limit_bytes=vmem_limit),
        cost_estimate=cost,
    )
    return jax.jit(call)


# ----------------------------------------------------------------------------
# Two-pass fallback for maps too large to keep x and S_N resident in VMEM.
# ----------------------------------------------------------------------------
def _mm_tile(dim):
    for t in (512, 256, 128):
        if dim % t == 0:
            return t
    return dim  # full-extent block (legal per the (8,128)-or-full rule)


@functools.lru_cache(maxsize=None)
def _build_matmul(M, K, N, tm, tk, tn, a_name, b_name, out_name, precision):
    a_dt = jnp.dtype(a_name)
    b_dt = jnp.dtype(b_name)
    out_dt = jnp.dtype(out_name)

    def kernel(a_ref, b_ref, o_ref, acc_ref):
        @pl.when(pl.program_id(2) == 0)
        def _():
            acc_ref[...] = jnp.zeros_like(acc_ref)

        acc_ref[...] += jnp.dot(a_ref[...], b_ref[...],
                                preferred_element_type=jnp.float32,
                                precision=precision)

        @pl.when(pl.program_id(2) == pl.num_programs(2) - 1)
        def _():
            o_ref[...] = acc_ref[...].astype(o_ref.dtype)

    a_sz, b_sz, o_sz = a_dt.itemsize, b_dt.itemsize, out_dt.itemsize
    # A is re-read once per output-column pass, B once per output-row pass.
    cost = pl.CostEstimate(
        flops=2 * M * K * N,
        transcendentals=0,
        bytes_accessed=((N // tn) * M * K * a_sz + (M // tm) * K * N * b_sz
                        + M * N * o_sz))
    footprint = 2 * (tm * tk * a_sz + tk * tn * b_sz + tm * tn * o_sz) + tm * tn * 4
    vmem_limit = min(_vmem_cap_bytes(), max(footprint + (8 << 20), 32 << 20))

    call = pl.pallas_call(
        kernel,
        out_shape=jax.ShapeDtypeStruct((M, N), out_dt),
        grid_spec=pltpu.PrefetchScalarGridSpec(
            num_scalar_prefetch=0,
            grid=(M // tm, N // tn, K // tk),
            in_specs=[pl.BlockSpec((tm, tk), lambda i, j, k: (i, k)),
                      pl.BlockSpec((tk, tn), lambda i, j, k: (k, j))],
            out_specs=pl.BlockSpec((tm, tn), lambda i, j, k: (i, j)),
            scratch_shapes=[pltpu.VMEM((tm, tn), jnp.float32)]),
        compiler_params=pltpu.CompilerParams(
            dimension_semantics=("parallel", "parallel", "arbitrary"),
            vmem_limit_bytes=vmem_limit),
        cost_estimate=cost)
    return jax.jit(call)


def _matmul(a, b, out_dtype, precision):
    M, K = map(int, a.shape)
    K2, N = map(int, b.shape)
    assert K == K2
    tm, tk, tn = _mm_tile(M), _mm_tile(K), _mm_tile(N)
    f = _build_matmul(M, K, N, tm, tk, tn,
                      jnp.dtype(a.dtype).name, jnp.dtype(b.dtype).name,
                      jnp.dtype(out_dtype).name, precision)
    return f(a, b)


# ----------------------------------------------------------------------------
# Wrapper
# ----------------------------------------------------------------------------
def idct_idxst(x, expkM=None, expkN=None, *, operand_dtype=None, tm=None,
               precision=None, force_two_pass=False):
    """Pallas TPU implementation of dct2_fft2.IDCT_IDXST.forward(x).

    operand_dtype: dtype fed to the MXU (accumulation is always f32).  Default
      is x.dtype (module semantics); jnp.bfloat16 is the recommended fast path
      on v6e/v7x (the bases are smooth |.|<=1 cos/sin values).
    precision: optional jax.lax.Precision for both matmuls (e.g. HIGHEST to
      force full-precision f32 MXU passes).
    """
    assert x.ndim == 2, "IDCT_IDXST operates on a 2-D (M, N) map"
    M, N = map(int, x.shape)
    out_dtype = jnp.dtype(x.dtype)
    operand_dtype = jnp.dtype(x.dtype if operand_dtype is None else operand_dtype)
    op_name, out_name = operand_dtype.name, out_dtype.name
    op_sz, out_sz = operand_dtype.itemsize, out_dtype.itemsize

    # expk tables of the wrong length are regenerated, exactly like the module.
    if expkM is not None and expkM.shape[-2] != M:
        expkM = None
    if expkN is not None and expkN.shape[-2] != N:
        expkN = None
    cm, sn = _get_bases(M, N, operand_dtype, expkM, expkN)
    x_op = x if x.dtype == operand_dtype else x.astype(operand_dtype)

    single_buf = bool(_buffered1_supported())
    budget = int(_vmem_cap_bytes() * 0.85)

    if force_two_pass:
        picked = None
    elif tm is not None:
        assert M % tm == 0, (M, tm)
        picked = int(tm)
    else:
        picked = _single_pass_tm(M, N, op_sz, out_sz, budget,
                                 1 if single_buf else 2)

    if picked is not None:
        f = _build_single_pass(M, N, int(picked), op_name, out_name,
                               single_buf, precision)
        return f(cm, x_op, sn)

    # Large-map fallback (e.g. 4096x4096 f32 on v7x's 64 MiB VMEM): two standard
    # tiled matmuls through HBM.  The extra (M, N) intermediate round trip is
    # cheap relative to the M^2*N + M*N^2 matmul FLOPs.
    tmp = _matmul(cm, x_op, operand_dtype, precision)   # IDCT along M
    return _matmul(tmp, sn, out_dtype, precision)       # IDXST along N


# ----------------------------------------------------------------------------
# Demo / self-check
# ----------------------------------------------------------------------------
if __name__ == "__main__":
    def reference(xx):
        Mr, Nr = xx.shape
        u = jnp.arange(Mr, dtype=jnp.float32)
        p = jnp.arange(Mr, dtype=jnp.float32)
        v = jnp.arange(Nr, dtype=jnp.float32)
        q = jnp.arange(Nr, dtype=jnp.float32)
        C = jnp.cos(jnp.pi * jnp.outer(2.0 * u + 1.0, p) / (2.0 * Mr))   # [u, p]
        S = jnp.sin(jnp.pi * jnp.outer(q, 2.0 * v + 1.0) / (2.0 * Nr))   # [q, v]
        return jnp.einsum("up,pq,qv->uv", C, xx.astype(jnp.float32), S,
                          precision=jax.lax.Precision.HIGHEST)

    def rel_err(a, b):
        a = a.astype(jnp.float32)
        b = b.astype(jnp.float32)
        return float(jnp.linalg.norm(a - b) / (jnp.linalg.norm(b) + 1e-30))

    key = jax.random.PRNGKey(0)

    # Case 1: f32, MXU-aligned shape (single-pass resident path, 2 row tiles).
    M, N = 128, 256
    x = jax.random.normal(key, (M, N), dtype=jnp.float32)
    ref = reference(x)
    out = jax.block_until_ready(idct_idxst(x))
    assert out.shape == (M, N) and out.dtype == x.dtype
    e1 = rel_err(out, ref)
    assert e1 < 1e-2, f"f32 rel err too large: {e1}"

    # Case 2: bf16 operands / f32 accumulation (v6e/v7x fast path).
    out_bf = jax.block_until_ready(idct_idxst(x, operand_dtype=jnp.bfloat16))
    assert out_bf.shape == (M, N) and out_bf.dtype == x.dtype
    e2 = rel_err(out_bf, ref)
    assert e2 < 3e-2, f"bf16 rel err too large: {e2}"

    # Case 3: caller-supplied expk tables (nn.Module-style usage).
    ekM = precompute_expk(M, jnp.float32)
    ekN = precompute_expk(N, jnp.float32)
    out_ek = jax.block_until_ready(idct_idxst(x, ekM, ekN))
    e3 = rel_err(out_ek, ref)
    assert e3 < 1e-2, f"expk-path rel err too large: {e3}"

    # Case 4: two-pass large-map fallback path exercised at a small shape.
    out_2p = jax.block_until_ready(idct_idxst(x, force_two_pass=True))
    e4 = rel_err(out_2p, ref)
    assert e4 < 1e-2, f"two-pass rel err too large: {e4}"

    # Case 5: non-MXU-sized shape exercising the full-extent block paths.
    x2 = jax.random.normal(jax.random.PRNGKey(1), (64, 96), dtype=jnp.float32)
    out2 = jax.block_until_ready(idct_idxst(x2))
    assert out2.shape == (64, 96) and out2.dtype == x2.dtype
    e5 = rel_err(out2, reference(x2))
    assert e5 < 1e-2, f"small-shape rel err too large: {e5}"

    print("KERNEL_OK")
</pallas_src>

<mosaic_0001>
module attributes {stable_mosaic.version = 11 : i64} {
  func.func @_probe(%arg0: i32, %arg1: memref<8x128xf32, #tpu.memory_space<vmem>>, %arg2: memref<8x128xf32, #tpu.memory_space<vmem>>) attributes {dimension_semantics = [#tpu.dimension_semantics<arbitrary>], iteration_bounds = array<i64: 2>, scalar_prefetch = 0 : i64, scratch_operands = 0 : i64, tpu.core_type = #tpu.core_type<tc>, window_params = [{pipeline_mode = #tpu.pipeline_mode<synchronous>, transform_indices = @transform_0, window_bounds = array<i64: 8, 128>}, {pipeline_mode = #tpu.pipeline_mode<synchronous>, transform_indices = @transform_1, window_bounds = array<i64: 8, 128>}]} {
    %c0 = arith.constant 0 : index
    %c0_0 = arith.constant 0 : index
    %0 = vector.load %arg1[%c0, %c0_0] : memref<8x128xf32, #tpu.memory_space<vmem>>, vector<8x128xf32>
    %cst = arith.constant 1.000000e+00 : f32
    %1 = vector.broadcast %cst : f32 to vector<8x128xf32>
    %2 = arith.addf %0, %1 : vector<8x128xf32>
    %c0_1 = arith.constant 0 : index
    %c0_2 = arith.constant 0 : index
    %3 = vector.load %arg2[%c0_1, %c0_2] : memref<8x128xf32, #tpu.memory_space<vmem>>, vector<8x128xf32>
    tpu.vector_store %arg2[%c0_1, %c0_2], %2 {strides = array<i32>} : memref<8x128xf32, #tpu.memory_space<vmem>>, vector<8x128xf32>,
    return
  }
  func.func @transform_0(%arg0: i32) -> (i32, i32) {
    %c0_i32 = arith.constant 0 : i32
    %c0_i32_0 = arith.constant 0 : i32
    %c0_i32_1 = arith.constant 0 : i32
    return %c0_i32, %c0_i32_0 : i32, i32
  }
  func.func @transform_1(%arg0: i32) -> (i32, i32) {
    %c0_i32 = arith.constant 0 : i32
    %c0_i32_0 = arith.constant 0 : i32
    %c0_i32_1 = arith.constant 0 : i32
    return %c0_i32, %c0_i32_0 : i32, i32
  }
}

module attributes {stable_mosaic.version = 11 : i64} {
  func.func @kernel(%arg0: i32, %arg1: memref<64x128xf32, #tpu.memory_space<vmem>>, %arg2: memref<128x256xf32, #tpu.memory_space<vmem>>, %arg3: memref<256x256xf32, #tpu.memory_space<vmem>>, %arg4: memref<64x256xf32, #tpu.memory_space<vmem>>) attributes {dimension_semantics = [#tpu.dimension_semantics<parallel>], iteration_bounds = array<i64: 2>, scalar_prefetch = 0 : i64, scratch_operands = 0 : i64, tpu.core_type = #tpu.core_type<tc>, window_params = [{transform_indices = @transform_0, window_bounds = array<i64: 64, 128>}, {pipeline_mode = #tpu.pipeline_mode<synchronous>, transform_indices = @transform_1, window_bounds = array<i64: 128, 256>}, {pipeline_mode = #tpu.pipeline_mode<synchronous>, transform_indices = @transform_2, window_bounds = array<i64: 256, 256>}, {transform_indices = @transform_3, window_bounds = array<i64: 64, 256>}]} {
    %c0 = arith.constant 0 : index
    %c0_0 = arith.constant 0 : index
    %0 = vector.load %arg1[%c0, %c0_0] : memref<64x128xf32, #tpu.memory_space<vmem>>, vector<64x128xf32>
    %c0_1 = arith.constant 0 : index
    %c0_2 = arith.constant 0 : index
    %1 = vector.load %arg2[%c0_1, %c0_2] : memref<128x256xf32, #tpu.memory_space<vmem>>, vector<128x256xf32>
    %cst = arith.constant dense<0.000000e+00> : vector<64x256xf32>
    %2 = tpu.matmul %0, %1, %cst {dimension_numbers = #tpu.dot_dimension_numbers<[1], [0], [0], [1], [0, 0, 1, 1], [], []>} : vector<64x128xf32>, vector<128x256xf32>, vector<64x256xf32> -> vector<64x256xf32>
    %c0_3 = arith.constant 0 : index
    %c0_4 = arith.constant 0 : index
    %3 = vector.load %arg3[%c0_3, %c0_4] : memref<256x256xf32, #tpu.memory_space<vmem>>, vector<256x256xf32>
    %cst_5 = arith.constant dense<0.000000e+00> : vector<64x256xf32>
    %4 = tpu.matmul %2, %3, %cst_5 {dimension_numbers = #tpu.dot_dimension_numbers<[1], [0], [0], [1], [0, 0, 1, 1], [], []>} : vector<64x256xf32>, vector<256x256xf32>, vector<64x256xf32> -> vector<64x256xf32>
    %c0_6 = arith.constant 0 : index
    %c0_7 = arith.constant 0 : index
    %5 = vector.load %arg4[%c0_6, %c0_7] : memref<64x256xf32, #tpu.memory_space<vmem>>, vector<64x256xf32>
    tpu.vector_store %arg4[%c0_6, %c0_7], %4 {strides = array<i32>} : memref<64x256xf32, #tpu.memory_space<vmem>>, vector<64x256xf32>,
    return
  }
  func.func @transform_0(%arg0: i32) -> (i32, i32) {
    %c0_i32 = arith.constant 0 : i32
    %c0_i32_0 = arith.constant 0 : i32
    return %arg0, %c0_i32 : i32, i32
  }
  func.func @transform_1(%arg0: i32) -> (i32, i32) {
    %c0_i32 = arith.constant 0 : i32
    %c0_i32_0 = arith.constant 0 : i32
    %c0_i32_1 = arith.constant 0 : i32
    return %c0_i32, %c0_i32_0 : i32, i32
  }
  func.func @transform_2(%arg0: i32) -> (i32, i32) {
    %c0_i32 = arith.constant 0 : i32
    %c0_i32_0 = arith.constant 0 : i32
    %c0_i32_1 = arith.constant 0 : i32
    return %c0_i32, %c0_i32_0 : i32, i32
  }
  func.func @transform_3(%arg0: i32) -> (i32, i32) {
    %c0_i32 = arith.constant 0 : i32
    %c0_i32_0 = arith.constant 0 : i32
    return %arg0, %c0_i32 : i32, i32
  }
}

</mosaic_0001>

<bundles_post_ra>
// kernel: tpu_custom_call.1
= control target key start
LH: loop header
LB: loop body
LE: loop exit
PB: predicated region body
PF: predicated region fallthrough
CT: control target
= control target key end

     0   :  { %6 = vsyncpa [#allocation3], 0  ;;  %s341_s0 = inlined_call_operand.hbm [shape: f32[8,128], index: 0, kind: input, shape index: {}]   ;;  %s342_s1 = inlined_call_operand.hbm [shape: f32[8,128], index: 1, kind: output, shape index: {}]  }
   0x1   :  { %7 = vsyncpa [#allocation4], 0  ;;  %s262_s6 = smov 0  }
   0x2 LB: > { %s145_s7 = sadd.s32 4294967295, %s248_s6   ;;  %p146_p0 = scmp.ge.s32.totalorder %s248_s6, 1  ;;  %s248_s6 = sphi %s262_s6, %s13_s6  }
   0x3   : > { %p60_p1 = scmp.lt.s32.totalorder %s248_s6, 3  ;;  %p276_p3 = scmp.eq.s32.totalorder %s145_s7, 0 }
   0x4   : > { %s250_s10 = smov [#allocation2]   ;;  %s180_s15 = scalar_lea.hbm %s341_s0, 128 }
   0x5   : > { %p270_p2 = pnand %p146_p0, %p60_p1  ;;  %s73_s11 = sshll.u32 %s250_s10, 4  ;;  %s74_s11 = int_to_ptr.vmem [resolvable:$true] %s73_s11 }
   0x6   : > { %s347_s9 = scalar_select %p276_p3, 1, 0 }
   0x7   : > { %s346_s8 = scalar_select %p270_p2, 1, 0 }
   0x8   : > { %p162_p4 = pneg %p270_p2  ;;  %p181_p6 = scmp.ne.s32.totalorder %s341_s0, %s180_s15 }
   0x9   : > { %p187_p10 = scmp.lt.u32.totalorder %s180_s15, %s341_s0 }
   0xa   : > { %p284_p5 = pnand %p276_p3, %p162_p4 }
   0xc   : > { %p182_p7 = pneg %p284_p5 }
   0xe   : > { %p183_p8 = pnand %p182_p7, %p181_p6 }
  0x10   : > { %p184_p9 = pneg %p183_p8 }
  0x12   : > { %p189_p11 = pnand %p187_p10, %p184_p9 }
  0x14   : > { %192 = shalt.err (!%p189_p11)
}
  0x15   : > { %s193_s20 = scalar_lea.vmem %s74_s11, 128  ;;  %p201_p1 = scmp.lt.s32.totalorder %s74_s11, %s74_s11 }
  0x16   : > { %p194_p12 = scmp.ne.s32.totalorder %s74_s11, %s193_s20  ;;  %p202_p4 = scmp.lt.s32.totalorder %s193_s20, %s193_s20 }
  0x18   : > { %p196_p13 = pnand %p194_p12, %p182_p7  ;;  %p203_p3 = por %p202_p4, %p201_p1 }
  0x1a   : > { %p197_p0 = pneg %p196_p13 }
  0x1c   : > { %p204_p2 = pnand %p203_p3, %p197_p0 }
  0x1e   : > { %207 = shalt.err (!%p204_p2)
}
  0x1f   : > { %165 = dma.hbm_to_vmem [thread:$0]  (!%p284_p5), %s341_s0, 128, %s74_s11, [#allocation3]  }
  0x20   : > { %p349_p6 = scmp.ne.s32.totalorder %s346_s8, 0 }
  0x21   : > { %p350_p8 = scmp.ne.s32.totalorder (!%p349_p6), %s347_s9, 0 }
  0x22   : > { %86 = sbr.rel (%p349_p6) target bundleno = 67 (0x43), region = 24 }
  0x29   : > { %239 = dma.done.wait (%p350_p8), [#allocation3], 128  }
  0x2a   : > { %241 = vsyncadd (%p350_p8), [#allocation3], 4294967168  ;;  %s251_s23 = smov [#allocation5]   ;;  %v96_v0 = vld [vmem:[#allocation2] sm:$0xff]  ;;  %p312_p2 = scmp.eq.s32.totalorder %s145_s7, 1 }
  0x2b   : > { %s106_s24 = sshll.u32 %s251_s23, 4  ;;  %v97_v1 = vadd.f32 1.0, %v96_v0  ;;  %s107_s24 = int_to_ptr.vmem [resolvable:$true] %s106_s24 }
  0x2c   : > { %s208_s26 = scalar_lea.vmem %s107_s24, 128  ;;  %p215_p9 = scmp.lt.s32.totalorder %s107_s24, %s107_s24 }
  0x2d   : > { %98 = vst [vmem:[#allocation5] sm:$0xff] %v97_v1  ;;  %p209_p3 = scmp.ne.s32.totalorder %s107_s24, %s208_s26  ;;  %p216_p10 = scmp.lt.s32.totalorder %s208_s26, %s208_s26 }
  0x2f   : > { %p210_p5 = pnand %p209_p3, %p312_p2  ;;  %p217_p11 = por %p216_p10, %p215_p9 }
  0x31   : > { %p211_p7 = pneg %p210_p5 }
  0x33   : > { %p218_p12 = pnand %p217_p11, %p211_p7 }
  0x35   : > { %221 = shalt.err (!%p218_p12)
}
  0x36   : > { %s222_s29 = scalar_lea.hbm %s342_s1, 128 }
  0x37   : > { %p223_p13 = scmp.ne.s32.totalorder %s342_s1, %s222_s29  ;;  %p228_p4 = scmp.lt.u32.totalorder %s222_s29, %s342_s1 }
  0x39   : > { %p224_p0 = pnand %p223_p13, %p312_p2 }
  0x3b   : > { %p225_p1 = pneg %p224_p0 }
  0x3d   : > { %p230_p6 = pnand %p228_p4, %p225_p1 }
  0x3f   : > { %233 = shalt.err (!%p230_p6)
}
  0x40   : > { %159 = dma.vmem_to_hbm [thread:$0]  (%p312_p2), %s107_s24, 128, %s342_s1, [#allocation4]  }
  0x41   : > { %243 = dma.done.wait (%p312_p2), [#allocation4], 128  }
  0x42   : > { %245 = vsyncadd (%p312_p2), [#allocation4], 4294967168 }
  0x43 PF: > { %s13_s6 = sadd.s32 1, %s248_s6  }
  0x44   : > { %p10_p8 = scmp.ge.s32.totalorder %s13_s6, 4  }
  0x46   :  { %12 = sbr.rel (!%p10_p8) target bundleno = 2 (0x2), region = 53 }
  0x4d   :  { %119 = vsyncpa [#allocation3], 1 }
  0x4e   :  { %121 = vsyncpa [#allocation3 + $0x1], 1 }
  0x4f   :  { %122 = vsyncpa [#allocation4], 1 }
  0x50   :  { %124 = vsyncpa [#allocation4 + $0x1], 1 }

// kernel: tpu_custom_call.1
= control target key start
LH: loop header
LB: loop body
LE: loop exit
PB: predicated region body
PF: predicated region fallthrough
CT: control target
= control target key end

     0   :  { %8 = vsyncpa [#allocation3], 0  ;;  %s1326_s0 = inlined_call_operand.hbm [shape: f32[128,128], index: 0, kind: input, shape index: {}]   ;;  %s1327_s1 = inlined_call_operand.hbm [shape: f32[128,256], index: 1, kind: input, shape index: {}]   ;;  %s1328_s2 = inlined_call_operand.hbm [shape: f32[256,256], index: 2, kind: input, shape index: {}]   ;;  %s1329_s3 = inlined_call_operand.hbm [shape: f32[128,256], index: 3, kind: output, shape index: {}]  }
   0x1   :  { %10 = vsyncpa [#allocation3 + $0x1], 0 }
   0x2   :  { %11 = vsyncpa [#allocation6], 0 }
   0x3   :  { %12 = vsyncpa [#allocation4], 0 }
   0x4   :  { %14 = vsyncpa [#allocation4 + $0x1], 0  ;;  %s1054_s12 = smov 0   ;;  %s1056_s13 = smov 0  }
   0x5   :  { %s1058_s14 = smov 0   ;;  %s1060_s15 = smov 0  }
   0x6 LB: > { %s1075_s16 = sadd.s32 4294967295, %s1021_s15   ;;  %s673_s17 = sadd.s32 4294967294, %s1021_s15   ;;  %s1021_s15 = sphi %s1060_s15, %s1349_s15   ;;  %s1017_s14 = sphi %s1058_s14, %s1348_s14   ;;  %s1013_s13 = sphi %s1056_s13, %s1347_s13   ;;  %s1009_s12 = sphi %s1054_s12, %s1346_s12  }
   0x7   : > { %p40_p0 = scmp.ne.s32.totalorder %s1013_s13, %s1009_s12  ;;  %p1330_p1 = scmp.eq.s32.totalorder %s1075_s16, 0 }
   0x8   : > { %p112_p3 = scmp.eq.s32.totalorder %s673_s17, 1  ;;  %p674_p5 = scmp.ge.s32.totalorder %s1021_s15, 1 }
   0x9   : > { %p1084_p4 = por %p1330_p1, %p40_p0  ;;  %p119_p7 = scmp.lt.s32.totalorder %s1021_s15, 3 }
   0xa   : > { %p1089_p6 = por %p112_p3, %p40_p0  ;;  %s1023_s21 = smov [#allocation5]  }
   0xb   : > { %s1333_s18 = scalar_select %p1084_p4, 1, 0 }
   0xc   : > { %s1334_s19 = scalar_select %p1089_p6, 1, 0 }
   0xd   : > { %p1094_p8 = pnand %p674_p5, %p119_p7  ;;  %s131_s22 = sshll.u32 %s1023_s21, 4  ;;  %s1098_s22 = int_to_ptr.vmem [resolvable:$true] %s131_s22 }
   0xe   : > { %s1024_s24 = smov [#allocation7]   ;;  %s865_s28 = scalar_lea.hbm %s1327_s1, 4096 }
   0xf   : > { %p803_p9 = pneg %p1094_p8  ;;  %s144_s25 = sshll.u32 %s1024_s24, 4  ;;  %s1109_s25 = int_to_ptr.vmem [resolvable:$true] %s144_s25 }
  0x10   : > { %p866_p12 = scmp.ne.s32.totalorder %s1327_s1, %s865_s28  ;;  %p872_p5 = scmp.lt.u32.totalorder %s865_s28, %s1327_s1 }
  0x11   : > { %p1105_p11 = pnand %p803_p9, %p1330_p1 }
  0x13   : > { %p867_p13 = pneg %p1105_p11 }
  0x15   : > { %p868_p0 = pnand %p867_p13, %p866_p12 }
  0x17   : > { %p869_p3 = pneg %p868_p0 }
  0x19   : > { %p874_p7 = pnand %p872_p5, %p869_p3 }
  0x1b   : > { %877 = shalt.err (!%p874_p7)
}
  0x1c   : > { %s878_s6 = scalar_lea.vmem %s1098_s22, 4096  ;;  %p886_p2 = scmp.lt.s32.totalorder %s1098_s22, %s1098_s22 }
  0x1d   : > { %p879_p9 = scmp.ne.s32.totalorder %s1098_s22, %s878_s6  ;;  %p887_p12 = scmp.lt.s32.totalorder %s878_s6, %s878_s6 }
  0x1f   : > { %p881_p10 = pnand %p879_p9, %p867_p13  ;;  %p888_p0 = por %p887_p12, %p886_p2 }
  0x21   : > { %p882_p1 = pneg %p881_p10 }
  0x23   : > { %p889_p6 = pnand %p888_p0, %p882_p1 }
  0x25   : > { %892 = shalt.err (!%p889_p6)
}
  0x26   : > { %s1025_s7 = smov 256   ;;  %s1026_s8 = smov 16  }
  0x27   : > { %806 = dma.hbm_to_vmem [thread:$0]  (!%p1105_p11), %s1327_s1, 4096, %s1098_s22, [#allocation6], %s1025_s7, %s1025_s7, %s1026_s8  }
  0x28   : > { %s893_s21 = scalar_lea.hbm %s1328_s2, 8192 }
  0x29   : > { %p894_p2 = scmp.ne.s32.totalorder %s1328_s2, %s893_s21  ;;  %p900_p10 = scmp.lt.u32.totalorder %s893_s21, %s1328_s2 }
  0x2b   : > { %p896_p1 = pnand %p894_p2, %p867_p13 }
  0x2d   : > { %p897_p6 = pneg %p896_p1 }
  0x2f   : > { %p902_p3 = pnand %p900_p10, %p897_p6 }
  0x31   : > { %905 = shalt.err (!%p902_p3)
}
  0x32   : > { %s906_s22 = scalar_lea.vmem %s1109_s25, 8192  ;;  %p914_p12 = scmp.lt.s32.totalorder %s1109_s25, %s1109_s25 }
  0x33   : > { %p907_p5 = scmp.ne.s32.totalorder %s1109_s25, %s906_s22  ;;  %p915_p0 = scmp.lt.s32.totalorder %s906_s22, %s906_s22 }
  0x35   : > { %p909_p7 = pnand %p907_p5, %p867_p13  ;;  %p916_p2 = por %p915_p0, %p914_p12 }
  0x37   : > { %p910_p9 = pneg %p909_p7 }
  0x39   : > { %p917_p1 = pnand %p916_p2, %p910_p9 }
  0x3b   : > { %920 = shalt.err (!%p917_p1)
}
  0x3c   : > { %809 = dma.hbm_to_vmem [thread:$0]  (!%p1105_p11), %s1328_s2, 8192, %s1109_s25, [#allocation6], %s1025_s7, %s1025_s7, %s1026_s8  }
  0x3d   : > { %s1164_s4 = sadd.s32 1, %s1021_s15   ;;  %s27_s23 = sadd.s32 1, %s1017_s14 }
  0x3e   : > { %s24_s5 = ssub.s32 %s1021_s15, %s1164_s4  ;;  %p34_p13 = scmp.ne.s32.totalorder %s1017_s14, %s1013_s13 }
  0x3f   : > { %p25_p6 = scmp.eq.s32.totalorder %s24_s5, 0  ;;  %p35_p10 = scmp.eq.s32.totalorder %s1021_s15, 0 }
  0x40   : > { %p1337_p3 = scmp.eq.s32.totalorder %s1075_s16, 1  ;;  %p820_p7 = scmp.lt.s32.totalorder %s1021_s15, 2 }
  0x41   : > { %s1180_s9 = scalar_select %p25_p6, %s1017_s14, %s27_s23  }
  0x42   : > { %p1174_p5 = por %p1337_p3, %p34_p13  ;;  %p36_p9 = por %p35_p10, %p34_p13 }
  0x43   : > { %s158_s10 = sand.u32 1, %s1017_s14   ;;  %s692_s25 = sshll.u32 %s1021_s15, 10 }
  0x44   : > { %s1338_s6 = scalar_select %p1174_p5, 1, 0 }
  0x45   : > { %s678_s11 = sshll.u32 %s158_s10, 6  ;;  %s1187_s17 = scalar_lea.hbm %s1326_s0, %s692_s25 }
  0x46   : > { %s162_s21 = scalar_lea.vmem [#allocation2], %s678_s11  ;;  %p1191_p11 = pnand %p820_p7, %p36_p9 }
  0x47   : > { %s169_s24 = sshll.u32 %s162_s21, 4  ;;  %s1195_s27 = scalar_lea.sflag [#allocation3], %s158_s10  ;;  %s1189_s24 = int_to_ptr.vmem [resolvable:$true] %s169_s24 }
  0x48   : > { %s921_s28 = scalar_lea.hbm %s1187_s17, 1024  ;;  %p923_p0 = pneg %p1191_p11 }
  0x49   : > { %p922_p12 = scmp.ne.s32.totalorder %s1187_s17, %s921_s28  ;;  %s926_s30 = scalar_lea.hbm %s1326_s0, 2048 }
  0x4a   : > { %p927_p13 = scmp.lt.u32.totalorder %s1187_s17, %s1326_s0  ;;  %p928_p6 = scmp.lt.u32.totalorder %s926_s30, %s921_s28 }
  0x4b   : > { %p924_p2 = pnand %p923_p0, %p922_p12  ;;  %p930_p3 = scmp.lt.u32.totalorder %s921_s28, %s1187_s17 }
  0x4c   : > { %p929_p10 = por %p928_p6, %p927_p13 }
  0x4d   : > { %p925_p1 = pneg %p924_p2 }
  0x4e   : > { %p931_p7 = por %p930_p3, %p929_p10 }
  0x50   : > { %p932_p9 = pnand %p931_p7, %p925_p1 }
  0x52   : > { %935 = shalt.err (!%p932_p9)
}
  0x53   : > { %s936_s10 = scalar_lea.vmem %s1189_s24, 1024  ;;  %s1027_s11 = smov [#allocation2]  }
  0x54   : > { %p937_p12 = scmp.ne.s32.totalorder %s1189_s24, %s936_s10  ;;  %s941_s25 = sshll.u32 %s1027_s11, 4  ;;  %s942_s25 = int_to_ptr.vmem [resolvable:$false] %s941_s25 }
  0x55   : > { %s943_s7 = scalar_lea.vmem %s942_s25, 2048  ;;  %p944_p4 = scmp.lt.s32.totalorder %s1189_s24, %s942_s25 }
  0x56   : > { %p939_p2 = pnand %p937_p12, %p923_p0  ;;  %p945_p13 = scmp.lt.s32.totalorder %s943_s7, %s936_s10 }
  0x58   : > { %p940_p5 = pneg %p939_p2  ;;  %p946_p6 = por %p945_p13, %p944_p4 }
  0x5a   : > { %p947_p10 = pnand %p946_p6, %p940_p5 }
  0x5c   : > { %950 = shalt.err (!%p947_p10)
}
  0x5d   : > { %s1028_s8 = smov 128   ;;  %s1029_s21 = smov 8  }
  0x5e   : > { %813 = dma.hbm_to_vmem [thread:$0]  (!%p1191_p11), %s1187_s17, 1024, %s1189_s24, %s1195_s27, %s1028_s8, %s1028_s8, %s1029_s21  }
  0x5f   : > { %181 = sbr.rel (%p1094_p8) target bundleno = 611 (0x263), region = 32  ;;  %s1226_s28 = sand.u32 (!%p1094_p8), 1, %s1013_s13  }
  0x60   : > { %s682_s22 = sshll.u32 (!%p1094_p8), %s1226_s28, 6  ;;  %s184_s29 = scalar_lea.sflag (!%p1094_p8), [#allocation3], %s1226_s28 }
  0x61   : > { %s1230_s30 = scalar_lea.vmem (!%p1094_p8), [#allocation2], %s682_s22  ;;  %p1340_p4 = scmp.ne.s32.totalorder (!%p1094_p8), %s1333_s18, 0 }
  0x66   : > { %996 = dma.done.wait (%p1340_p4), %s184_s29, 1024  }
  0x67   : > { %998 = vsyncadd (%p1340_p4), %s184_s29, 4294966272  ;;  %p1341_p5 = scmp.eq.s32.totalorder %s1075_s16, 0 }
  0x69   : > { %1000 = dma.done.wait (%p1341_p5), [#allocation6], 12288   ;;  %p1342_p8 = pmov %p1341_p5 }
  0x6a   : > { %v1030_v0 = vmov 0.0   ;;  %v229_v1 = vld [vmem:[#allocation5 + $0x8] sm:$0xff]  ;;  %v231_v2 = vld [vmem:[#allocation5 + $0x18] sm:$0xff]  ;;  %v228_v3 = vld [vmem:[#allocation5] sm:$0xff]  ;;  %s685_s18 = sshll.u32 %s1226_s28, 7  ;;  %s694_s17 = sshll.u32 %s1075_s16, 11 }
  0x6b   : > { %1002 = vsyncadd (%p1342_p8), [#allocation6], 4294955008  ;;  %324 = vmatprep.mubr.f32.mxu0 %v1030_v0  ;;  %v695_v4 = vpack.c.bf16 %v231_v2, %v229_v1  ;;  %v230_v5 = vld [vmem:[#allocation5 + $0x10] sm:$0xff]  ;;  %v233_v6 = vld [vmem:[#allocation5 + $0x28] sm:$0xff]  ;;  %s1257_s20 = scalar_lea.vmem [#allocation8], %s685_s18  ;;  %s1278_s23 = scalar_lea.hbm %s1329_s3, %s694_s17 }
  0x6c   : > { %v235_v7 = vld [vmem:[#allocation5 + $0x38] sm:$0xff]  ;;  %v697_v8 = vpack.c.bf16 %v230_v5, %v228_v3  ;;  %v232_v10 = vld [vmem:[#allocation5 + $0x20] sm:$0xff]  ;;  %v234_v11 = vld [vmem:[#allocation5 + $0x30] sm:$0xff]  ;;  %s581_s24 = sshll.u32 %s1257_s20, 4  ;;  %s567_s5 = scalar_lea.sflag [#allocation4], %s1226_s28  ;;  %s1280_s24 = int_to_ptr.vmem [resolvable:$true] %s581_s24 }
  0x6d   : > { %v699_v9 = vpack.c.bf16 %v235_v7, %v233_v6  ;;  %v237_v12 = vld [vmem:[#allocation5 + $0x48] sm:$0xff]  ;;  %696 = vmatprep.subr.bf16.mxu0 %v695_v4  ;;  %v239_v13 = vld [vmem:[#allocation5 + $0x58] sm:$0xff]  ;;  %v701_v14 = vpack.c.bf16 %v234_v11, %v232_v10  ;;  %v236_v16 = vld [vmem:[#allocation5 + $0x40] sm:$0xff]  ;;  %s951_s16 = scalar_lea.vmem %s1280_s24, 2048  ;;  %p1343_p0 = scmp.ne.s32.totalorder %s1338_s6, 0 }
  0x6e   : > { %698 = vmatpush1.bf16.msra.mxu0 %v697_v8  ;;  %v703_v15 = vpack.c.bf16 %v239_v13, %v237_v12  ;;  %v238_v17 = vld [vmem:[#allocation5 + $0x50] sm:$0xff]  ;;  %v241_v18 = vld [vmem:[#allocation5 + $0x68] sm:$0xff]  ;;  %v243_v19 = vld [vmem:[#allocation5 + $0x78] sm:$0xff]  ;;  %p952_p11 = scmp.ne.s32.totalorder %s1280_s24, %s951_s16  ;;  %s1031_s10 = smov [#allocation8]  }
  0x6f   : > { %700 = vmatprep.subr.bf16.mxu0 %v699_v9  ;;  %v705_v20 = vpack.c.bf16 %v238_v17, %v236_v16  ;;  %v707_v21 = vpack.c.bf16 %v243_v19, %v241_v18  ;;  %v240_v22 = vld [vmem:[#allocation5 + $0x60] sm:$0xff]  ;;  %v242_v23 = vld [vmem:[#allocation5 + $0x70] sm:$0xff]  ;;  %v245_v24 = vld [vmem:[#allocation5 + $0x88] sm:$0xff]  ;;  %s955_s11 = sshll.u32 %s1031_s10, 4  ;;  %s956_s11 = int_to_ptr.vmem [resolvable:$false] %s955_s11 }
  0x70   : > { %v247_v25 = vld [vmem:[#allocation5 + $0x98] sm:$0xff]  ;;  %v709_v26 = vpack.c.bf16 %v242_v23, %v240_v22  ;;  %v244_v27 = vld [vmem:[#allocation5 + $0x80] sm:$0xff]  ;;  %v246_v28 = vld [vmem:[#allocation5 + $0x90] sm:$0xff]  ;;  %p953_p1 = pnand %p952_p11, %p1343_p0  ;;  %s957_s25 = scalar_lea.vmem %s956_s11, 4096 }
  0x71   : > { %v249_v29 = vld [vmem:[#allocation5 + $0xa8] sm:$0xff]  ;;  %v711_v30 = vpack.c.bf16 %v247_v25, %v245_v24  ;;  %v251_v31 = vld [vmem:[#allocation5 + $0xb8] sm:$0xff]  ;;  %v373_v35 = vld [vmem:[#allocation7] sm:$0xff]  ;;  %v713_v42 = vpack.c.bf16 %v246_v28, %v244_v27  ;;  %p958_p7 = scmp.lt.s32.totalorder %s1280_s24, %s956_s11  ;;  %p959_p9 = scmp.lt.s32.totalorder %s957_s25, %s951_s16 }
  0x72   : > { %702 = vmatpush1.bf16.msra.mxu0 %v701_v14  ;;  %v374_v32 = vld [vmem:[#allocation7 + $0x8] sm:$0xff]  ;;  %v376_v33 = vld [vmem:[#allocation7 + $0x18] sm:$0xff]  ;;  %v375_v36 = vld [vmem:[#allocation7 + $0x10] sm:$0xff]  ;;  %v715_v46 = vpack.c.bf16 %v251_v31, %v249_v29  ;;  %p954_p3 = pneg %p953_p1 }
  0x73   : > { %704 = vmatprep.subr.bf16.mxu0 %v703_v15  ;;  %v727_v34 = vpack.c.bf16 %v376_v33, %v374_v32  ;;  %v378_v37 = vld [vmem:[#allocation7 + $0x28] sm:$0xff]  ;;  %v729_v38 = vpack.c.bf16 %v375_v36, %v373_v35  ;;  %v380_v39 = vld [vmem:[#allocation7 + $0x38] sm:$0xff]  ;;  %v377_v40 = vld [vmem:[#allocation7 + $0x20] sm:$0xff]  ;;  %p960_p12 = por %p959_p9, %p958_p7 }
  0x74   : > { %v379_v41 = vld [vmem:[#allocation7 + $0x30] sm:$0xff]  ;;  %v731_v43 = vpack.c.bf16 %v380_v39, %v378_v37  ;;  %v382_v44 = vld [vmem:[#allocation7 + $0x48] sm:$0xff]  ;;  %v384_v45 = vld [vmem:[#allocation7 + $0x58] sm:$0xff] }
  0x75   : > { %728 = vmatprep.subr.bf16.mxu1 %v727_v34  ;;  %v248_v47 = vld [vmem:[#allocation5 + $0xa0] sm:$0xff]  ;;  %v250_v48 = vld [vmem:[#allocation5 + $0xb0] sm:$0xff]  ;;  %v253_v49 = vld [vmem:[#allocation5 + $0xc8] sm:$0xff]  ;;  %v733_v50 = vpack.c.bf16 %v379_v41, %v377_v40  ;;  %v735_v52 = vpack.c.bf16 %v384_v45, %v382_v44  ;;  %p961_p2 = pnand %p960_p12, %p954_p3 }
  0x76   : > { %706 = vmatpush1.bf16.msra.mxu0 %v705_v20  ;;  %730 = vmatpush1.bf16.msra.mxu1 %v729_v38  ;;  %v255_v51 = vld [vmem:[#allocation5 + $0xd8] sm:$0xff]  ;;  %v381_v53 = vld [vmem:[#allocation7 + $0x40] sm:$0xff]  ;;  %v383_v54 = vld [vmem:[#allocation7 + $0x50] sm:$0xff]  ;;  %v717_v57 = vpack.c.bf16 %v250_v48, %v248_v47 }
  0x77   : > { %708 = vmatprep.subr.bf16.mxu0 %v707_v21  ;;  %732 = vmatprep.subr.bf16.mxu1 %v731_v43  ;;  %v386_v55 = vld [vmem:[#allocation7 + $0x68] sm:$0xff]  ;;  %v388_v56 = vld [vmem:[#allocation7 + $0x78] sm:$0xff]  ;;  %v719_v58 = vpack.c.bf16 %v255_v51, %v253_v49  ;;  %v252_v59 = vld [vmem:[#allocation5 + $0xc0] sm:$0xff]  ;;  %v737_v62 = vpack.c.bf16 %v383_v54, %v381_v53 }
  0x78   : > { %v254_v60 = vld [vmem:[#allocation5 + $0xd0] sm:$0xff]  ;;  %v257_v61 = vld [vmem:[#allocation5 + $0xe8] sm:$0xff]  ;;  %v259_v63 = vld [vmem:[#allocation5 + $0xf8] sm:$0xff]  ;;  %v739_v1 = vpack.c.bf16 %v388_v56, %v386_v55 }
  0x79   : > { %v385_v2 = vld [vmem:[#allocation7 + $0x60] sm:$0xff]  ;;  %v387_v3 = vld [vmem:[#allocation7 + $0x70] sm:$0xff]  ;;  %v390_v4 = vld [vmem:[#allocation7 + $0x88] sm:$0xff]  ;;  %v721_v6 = vpack.c.bf16 %v254_v60, %v252_v59  ;;  %v723_v7 = vpack.c.bf16 %v259_v63, %v257_v61 }
  0x7a   : > { %710 = vmatpush1.bf16.msra.mxu0 %v709_v26  ;;  %734 = vmatpush1.bf16.msra.mxu1 %v733_v50  ;;  %v392_v5 = vld [vmem:[#allocation7 + $0x98] sm:$0xff]  ;;  %v256_v8 = vld [vmem:[#allocation5 + $0xe0] sm:$0xff]  ;;  %v258_v9 = vld [vmem:[#allocation5 + $0xf0] sm:$0xff]  ;;  %v741_v10 = vpack.c.bf16 %v387_v3, %v385_v2 }
  0x7b   : > { %712 = vmatprep.subr.bf16.mxu0 %v711_v30  ;;  %736 = vmatprep.subr.bf16.mxu1 %v735_v52  ;;  %v743_v11 = vpack.c.bf16 %v392_v5, %v390_v4  ;;  %v389_v12 = vld [vmem:[#allocation7 + $0x80] sm:$0xff]  ;;  %v391_v13 = vld [vmem:[#allocation7 + $0x90] sm:$0xff]  ;;  %v394_v14 = vld [vmem:[#allocation7 + $0xa8] sm:$0xff]  ;;  %v725_v16 = vpack.c.bf16 %v258_v9, %v256_v8 }
  0x7c   : > { %v396_v15 = vld [vmem:[#allocation7 + $0xb8] sm:$0xff]  ;;  %v745_v17 = vpack.c.bf16 %v391_v13, %v389_v12  ;;  %v393_v19 = vld [vmem:[#allocation7 + $0xa0] sm:$0xff]  ;;  %v395_v20 = vld [vmem:[#allocation7 + $0xb0] sm:$0xff] }
  0x7d   : > { %v747_v18 = vpack.c.bf16 %v396_v15, %v394_v14  ;;  %v398_v21 = vld [vmem:[#allocation7 + $0xc8] sm:$0xff]  ;;  %v400_v22 = vld [vmem:[#allocation7 + $0xd8] sm:$0xff]  ;;  %v220_v23 = vld [vmem:[%s1230_s30] sm:$0xff]  ;;  %v749_v24 = vpack.c.bf16 %v395_v20, %v393_v19 }
  0x7e   : > { %714 = vmatpush1.bf16.msra.mxu0 %v713_v42  ;;  %738 = vmatpush1.bf16.msra.mxu1 %v737_v62  ;;  %v751_v25 = vpack.c.bf16 %v400_v22, %v398_v21  ;;  %v397_v26 = vld [vmem:[#allocation7 + $0xc0] sm:$0xff]  ;;  %v399_v27 = vld [vmem:[#allocation7 + $0xd0] sm:$0xff]  ;;  %v402_v28 = vld [vmem:[#allocation7 + $0xe8] sm:$0xff] }
  0x7f   : > { %716 = vmatprep.subr.bf16.mxu0 %v715_v46  ;;  %740 = vmatprep.subr.bf16.mxu1 %v739_v1  ;;  %v404_v29 = vld [vmem:[#allocation7 + $0xf8] sm:$0xff]  ;;  %v221_v30 = vld [vmem:[%s1230_s30 + $0x8] sm:$0xff]  ;;  %v753_v31 = vpack.c.bf16 %v399_v27, %v397_v26  ;;  %v401_v33 = vld [vmem:[#allocation7 + $0xe0] sm:$0xff] }
  0x80   : > { %v755_v32 = vpack.c.bf16 %v404_v29, %v402_v28  ;;  %v403_v34 = vld [vmem:[#allocation7 + $0xf0] sm:$0xff]  ;;  %v406_v35 = vld [vmem:[#allocation7 + $0x108] sm:$0xff]  ;;  %v408_v36 = vld [vmem:[#allocation7 + $0x118] sm:$0xff] }
  0x81   : > { %v222_v37 = vld [vmem:[%s1230_s30 + $0x10] sm:$0xff]  ;;  %v757_v38 = vpack.c.bf16 %v403_v34, %v401_v33  ;;  %v759_v39 = vpack.c.bf16 %v408_v36, %v406_v35  ;;  %v405_v40 = vld [vmem:[#allocation7 + $0x100] sm:$0xff]  ;;  %v410_v42 = vld [vmem:[#allocation7 + $0x128] sm:$0xff] }
  0x82   : > { %718 = vmatpush1.bf16.msra.mxu0 %v717_v57  ;;  %742 = vmatpush1.bf16.msra.mxu1 %v741_v10  ;;  %v407_v41 = vld [vmem:[#allocation7 + $0x110] sm:$0xff]  ;;  %v412_v43 = vld [vmem:[#allocation7 + $0x138] sm:$0xff]  ;;  %v409_v47 = vld [vmem:[#allocation7 + $0x120] sm:$0xff] }
  0x83   : > { %720 = vmatprep.subr.bf16.mxu0 %v719_v58  ;;  %744 = vmatprep.subr.bf16.mxu1 %v743_v11  ;;  %v223_v44 = vld [vmem:[%s1230_s30 + $0x18] sm:$0xff]  ;;  %v761_v45 = vpack.c.bf16 %v407_v41, %v405_v40  ;;  %v763_v46 = vpack.c.bf16 %v412_v43, %v410_v42  ;;  %v411_v48 = vld [vmem:[#allocation7 + $0x130] sm:$0xff]  ;;  %v414_v49 = vld [vmem:[#allocation7 + $0x148] sm:$0xff] }
  0x84   : > { %v416_v50 = vld [vmem:[#allocation7 + $0x158] sm:$0xff]  ;;  %v224_v51 = vld [vmem:[%s1230_s30 + $0x20] sm:$0xff]  ;;  %v765_v52 = vpack.c.bf16 %v411_v48, %v409_v47  ;;  %v415_v55 = vld [vmem:[#allocation7 + $0x150] sm:$0xff] }
  0x85   : > { %v767_v53 = vpack.c.bf16 %v416_v50, %v414_v49  ;;  %v413_v54 = vld [vmem:[#allocation7 + $0x140] sm:$0xff]  ;;  %v418_v56 = vld [vmem:[#allocation7 + $0x168] sm:$0xff]  ;;  %v420_v57 = vld [vmem:[#allocation7 + $0x178] sm:$0xff] }
  0x86   : > { %722 = vmatpush1.bf16.msra.mxu0 %v721_v6  ;;  %746 = vmatpush1.bf16.msra.mxu1 %v745_v17  ;;  %v225_v58 = vld [vmem:[%s1230_s30 + $0x28] sm:$0xff]  ;;  %v769_v59 = vpack.c.bf16 %v415_v55, %v413_v54  ;;  %v771_v60 = vpack.c.bf16 %v420_v57, %v418_v56  ;;  %v417_v61 = vld [vmem:[#allocation7 + $0x160] sm:$0xff]  ;;  %v419_v62 = vld [vmem:[#allocation7 + $0x170] sm:$0xff] }
  0x87   : > { %724 = vmatprep.subr.bf16.mxu0 %v723_v7  ;;  %748 = vmatprep.subr.bf16.mxu1 %v747_v18  ;;  %v422_v63 = vld [vmem:[#allocation7 + $0x188] sm:$0xff]  ;;  %v424_v1 = vld [vmem:[#allocation7 + $0x198] sm:$0xff]  ;;  %v226_v2 = vld [vmem:[%s1230_s30 + $0x30] sm:$0xff]  ;;  %v773_v3 = vpack.c.bf16 %v419_v62, %v417_v61 }
  0x88   : > { %v775_v4 = vpack.c.bf16 %v424_v1, %v422_v63  ;;  %v421_v5 = vld [vmem:[#allocation7 + $0x180] sm:$0xff]  ;;  %v423_v6 = vld [vmem:[#allocation7 + $0x190] sm:$0xff]  ;;  %v426_v7 = vld [vmem:[#allocation7 + $0x1a8] sm:$0xff] }
  0x89   : > { %v428_v8 = vld [vmem:[#allocation7 + $0x1b8] sm:$0xff]  ;;  %v777_v10 = vpack.c.bf16 %v423_v6, %v421_v5  ;;  %v425_v12 = vld [vmem:[#allocation7 + $0x1a0] sm:$0xff]  ;;  %v427_v13 = vld [vmem:[#allocation7 + $0x1b0] sm:$0xff] }
  0x8a   : > { %726 = vmatpush1.bf16.msra.mxu0 %v725_v16  ;;  %750 = vmatpush1.bf16.msra.mxu1 %v749_v24  ;;  %v227_v9 = vld [vmem:[%s1230_s30 + $0x38] sm:$0xff]  ;;  %v779_v11 = vpack.c.bf16 %v428_v8, %v426_v7  ;;  %v430_v14 = vld [vmem:[#allocation7 + $0x1c8] sm:$0xff]  ;;  %v781_v16 = vpack.c.bf16 %v427_v13, %v425_v12  ;;  %v429_v18 = vld [vmem:[#allocation7 + $0x1c0] sm:$0xff] }
  0x8b   : > { %752 = vmatprep.subr.bf16.mxu1 %v751_v25  ;;  %v432_v15 = vld [vmem:[#allocation7 + $0x1d8] sm:$0xff]  ;;  %v431_v19 = vld [vmem:[#allocation7 + $0x1d0] sm:$0xff]  ;;  %v434_v20 = vld [vmem:[#allocation7 + $0x1e8] sm:$0xff] }
  0x8c   : > { %v783_v17 = vpack.c.bf16 %v432_v15, %v430_v14  ;;  %v436_v21 = vld [vmem:[#allocation7 + $0x1f8] sm:$0xff]  ;;  %v435_v24 = vld [vmem:[#allocation7 + $0x1f0] sm:$0xff] }
  0x8d   : > { %325 = vmatmul.mubr.f32.vlgmr.msra.gmra.mrb[0].mxu0 %v220_v23  ;;  %v787_v22 = vpack.c.bf16 %v436_v21, %v434_v20  ;;  %v433_v23 = vld [vmem:[#allocation7 + $0x1e0] sm:$0xff] }
  0x8e   : > { %330 = vmatprep.mubr.f32.mxu0 %v1030_v0  ;;  %754 = vmatpush1.bf16.msra.mxu1 %v753_v31  ;;  %v789_v25 = vpack.c.bf16 %v435_v24, %v433_v23 }
  0x8f   : > { %756 = vmatprep.subr.bf16.mxu1 %v755_v32 }
  0x91   : > { %331 = vmatmul.mubr.f32.gmra.mrb[2].mxu0 %v221_v30 }
  0x92   : > { %336 = vmatprep.mubr.f32.mxu0 %v1030_v0  ;;  %758 = vmatpush1.bf16.msra.mxu1 %v757_v38 }
  0x93   : > { %760 = vmatprep.subr.bf16.mxu1 %v759_v39 }
  0x95   : > { %337 = vmatmul.mubr.f32.gmra.mrb[4].mxu0 %v222_v37 }
  0x96   : > { %342 = vmatprep.mubr.f32.mxu0 %v1030_v0  ;;  %762 = vmatpush1.bf16.msra.mxu1 %v761_v45 }
  0x97   : > { %764 = vmatprep.subr.bf16.mxu1 %v763_v46 }
  0x99   : > { %343 = vmatmul.mubr.f32.gmra.mrb[6].mxu0 %v223_v44 }
  0x9a   : > { %348 = vmatprep.mubr.f32.mxu0 %v1030_v0  ;;  %766 = vmatpush1.bf16.msra.mxu1 %v765_v52 }
  0x9b   : > { %768 = vmatprep.subr.bf16.mxu1 %v767_v53 }
  0x9d   : > { %349 = vmatmul.mubr.f32.gmra.mrb[8].mxu0 %v224_v51 }
  0x9e   : > { %354 = vmatprep.mubr.f32.mxu0 %v1030_v0  ;;  %770 = vmatpush1.bf16.msra.mxu1 %v769_v59 }
  0x9f   : > { %772 = vmatprep.subr.bf16.mxu1 %v771_v60 }
  0xa1   : > { %355 = vmatmul.mubr.f32.gmra.mrb[10].mxu0 %v225_v58 }
  0xa2   : > { %360 = vmatprep.mubr.f32.mxu0 %v1030_v0  ;;  %774 = vmatpush1.bf16.msra.mxu1 %v773_v3 }
  0xa3   : > { %776 = vmatprep.subr.bf16.mxu1 %v775_v4 }
  0xa5   : > { %361 = vmatmul.mubr.f32.gmra.mrb[12].mxu0 %v226_v2 }
  0xa6   : > { %366 = vmatprep.mubr.f32.mxu0 %v1030_v0  ;;  %778 = vmatpush1.bf16.msra.mxu1 %v777_v10  ;;  %v785_v0 = vpack.c.bf16 %v431_v19, %v429_v18 }
  0xa7   : > { %780 = vmatprep.subr.bf16.mxu1 %v779_v11 }
  0xa9   : > { %367 = vmatmul.mubr.f32.gmra.mrb[14].mxu0 %v227_v9 }
  0xaa   : > { %782 = vmatpush1.bf16.msra.mxu1 %v781_v16 }
  0xab   : > { %784 = vmatprep.subr.bf16.mxu1 %v783_v17 }
  0xae   : > { %786 = vmatpush1.bf16.msra.mxu1 %v785_v0 }
  0xaf   : > { %788 = vmatprep.subr.bf16.mxu1 %v787_v22 }
  0xb2   : > { %790 = vmatpush1.bf16.msra.mxu1 %v789_v25 }
 0x160   : > { %v326_v26 = vpop.f32.mrb[0].mxu0 }
 0x161   : > { %v328_v27 = vpop.f32.mrb[1].mxu0 }
 0x162   : > { %501 = vmatprep.mubr.f32.mxu1 %v328_v27 }
 0x163   : > { %502 = vmatmul.mubr.f32.vlgmr.msra.gmra.mrb[0].mxu1 %v326_v26 }
 0x164   : > { %v332_v28 = vpop.f32.mrb[2].mxu0 }
 0x165   : > { %v334_v29 = vpop.f32.mrb[3].mxu0 }
 0x166   : > { %507 = vmatprep.mubr.f32.mxu1 %v334_v29 }
 0x167   : > { %508 = vmatmul.mubr.f32.gmra.mrb[2].mxu1 %v332_v28 }
 0x168   : > { %v338_v30 = vpop.f32.mrb[4].mxu0 }
 0x169   : > { %v340_v31 = vpop.f32.mrb[5].mxu0 }
 0x16a   : > { %513 = vmatprep.mubr.f32.mxu1 %v340_v31 }
 0x16b   : > { %514 = vmatmul.mubr.f32.gmra.mrb[4].mxu1 %v338_v30 }
 0x16c   : > { %v344_v32 = vpop.f32.mrb[6].mxu0 }
 0x16d   : > { %v346_v33 = vpop.f32.mrb[7].mxu0 }
 0x16e   : > { %519 = vmatprep.mubr.f32.mxu1 %v346_v33 }
 0x16f   : > { %520 = vmatmul.mubr.f32.gmra.mrb[6].mxu1 %v344_v32 }
 0x170   : > { %v350_v34 = vpop.f32.mrb[8].mxu0 }
 0x171   : > { %v352_v35 = vpop.f32.mrb[9].mxu0 }
 0x172   : > { %525 = vmatprep.mubr.f32.mxu1 %v352_v35 }
 0x173   : > { %526 = vmatmul.mubr.f32.gmra.mrb[8].mxu1 %v350_v34 }
 0x174   : > { %v356_v36 = vpop.f32.mrb[10].mxu0 }
 0x175   : > { %v358_v37 = vpop.f32.mrb[11].mxu0 }
 0x176   : > { %531 = vmatprep.mubr.f32.mxu1 %v358_v37 }
 0x177   : > { %532 = vmatmul.mubr.f32.gmra.mrb[10].mxu1 %v356_v36 }
 0x178   : > { %v362_v38 = vpop.f32.mrb[12].mxu0 }
 0x179   : > { %v364_v39 = vpop.f32.mrb[13].mxu0 }
 0x17a   : > { %537 = vmatprep.mubr.f32.mxu1 %v364_v39 }
 0x17b   : > { %538 = vmatmul.mubr.f32.gmra.mrb[12].mxu1 %v362_v38 }
 0x17c   : > { %v368_v40 = vpop.f32.mrb[14].mxu0 }
 0x17d   : > { %v370_v41 = vpop.f32.mrb[15].mxu0 }
 0x17e   : > { %543 = vmatprep.mubr.f32.mxu1 %v370_v41 }
 0x17f   : > { %544 = vmatmul.mubr.f32.gmra.mrb[14].mxu1 %v368_v40 }
 0x236   : > { %v503_v42 = vpop.f32.mrb[0].mxu1 }
 0x237   : > { %550 = vst [vmem:[%s1257_s20] sm:$0xff] %v503_v42  ;;  %v505_v43 = vpop.f32.mrb[1].mxu1 }
 0x238   : > { %551 = vst [vmem:[%s1257_s20 + $0x8] sm:$0xff] %v505_v43 }
 0x23a   : > { %v509_v44 = vpop.f32.mrb[2].mxu1 }
 0x23b   : > { %552 = vst [vmem:[%s1257_s20 + $0x10] sm:$0xff] %v509_v44  ;;  %v511_v45 = vpop.f32.mrb[3].mxu1 }
 0x23c   : > { %553 = vst [vmem:[%s1257_s20 + $0x18] sm:$0xff] %v511_v45 }
 0x23e   : > { %v515_v46 = vpop.f32.mrb[4].mxu1 }
 0x23f   : > { %554 = vst [vmem:[%s1257_s20 + $0x20] sm:$0xff] %v515_v46  ;;  %v517_v47 = vpop.f32.mrb[5].mxu1 }
 0x240   : > { %555 = vst [vmem:[%s1257_s20 + $0x28] sm:$0xff] %v517_v47 }
 0x242   : > { %v521_v48 = vpop.f32.mrb[6].mxu1 }
 0x243   : > { %556 = vst [vmem:[%s1257_s20 + $0x30] sm:$0xff] %v521_v48  ;;  %v523_v49 = vpop.f32.mrb[7].mxu1 }
 0x244   : > { %557 = vst [vmem:[%s1257_s20 + $0x38] sm:$0xff] %v523_v49 }
 0x246   : > { %v527_v50 = vpop.f32.mrb[8].mxu1 }
 0x247   : > { %558 = vst [vmem:[%s1257_s20 + $0x40] sm:$0xff] %v527_v50  ;;  %v529_v51 = vpop.f32.mrb[9].mxu1 }
 0x248   : > { %559 = vst [vmem:[%s1257_s20 + $0x48] sm:$0xff] %v529_v51 }
 0x24a   : > { %v533_v52 = vpop.f32.mrb[10].mxu1 }
 0x24b   : > { %560 = vst [vmem:[%s1257_s20 + $0x50] sm:$0xff] %v533_v52  ;;  %v535_v53 = vpop.f32.mrb[11].mxu1 }
 0x24c   : > { %561 = vst [vmem:[%s1257_s20 + $0x58] sm:$0xff] %v535_v53 }
 0x24e   : > { %v539_v54 = vpop.f32.mrb[12].mxu1 }
 0x24f   : > { %562 = vst [vmem:[%s1257_s20 + $0x60] sm:$0xff] %v539_v54  ;;  %v541_v55 = vpop.f32.mrb[13].mxu1 }
 0x250   : > { %563 = vst [vmem:[%s1257_s20 + $0x68] sm:$0xff] %v541_v55 }
 0x252   : > { %v545_v56 = vpop.f32.mrb[14].mxu1 }
 0x253   : > { %564 = vst [vmem:[%s1257_s20 + $0x70] sm:$0xff] %v545_v56  ;;  %v547_v57 = vpop.f32.mrb[15].mxu1 }
 0x254   : > { %565 = vst [vmem:[%s1257_s20 + $0x78] sm:$0xff] %v547_v57 }
 0x255   : > { %964 = shalt.err (!%p961_p2)
}
 0x256   : > { %s965_s7 = scalar_lea.hbm %s1278_s23, 2048  ;;  %s969_s22 = scalar_lea.hbm %s1329_s3, 4096 }
 0x257   : > { %p966_p13 = scmp.ne.s32.totalorder %s1278_s23, %s965_s7  ;;  %p970_p4 = scmp.lt.u32.totalorder %s1278_s23, %s1329_s3 }
 0x258   : > { %p971_p5 = scmp.lt.u32.totalorder %s969_s22, %s965_s7  ;;  %p973_p11 = scmp.lt.u32.totalorder %s965_s7, %s1278_s23 }
 0x259   : > { %p967_p6 = pnand %p966_p13, %p1343_p0 }
 0x25a   : > { %p972_p8 = por %p971_p5, %p970_p4 }
 0x25b   : > { %p968_p10 = pneg %p967_p6 }
 0x25c   : > { %p974_p1 = por %p973_p11, %p972_p8 }
 0x25e   : > { %p975_p3 = pnand %p974_p1, %p968_p10 }
 0x260   : > { %978 = shalt.err (!%p975_p3)
}
 0x261   : > { %s1032_s18 = smov 256   ;;  %s1033_s20 = smov 16  }
 0x262   : > { %801 = dma.vmem_to_hbm [thread:$0]  (%p1343_p0), %s1280_s24, 2048, %s1278_s23, %s567_s5, %s1032_s18, %s1032_s18, %s1033_s20  }
 0x263 PF: > { %s596_s17 = sand.u32 1, %s1009_s12   ;;  %p1344_p7 = scmp.ne.s32.totalorder %s1334_s19, 0 }
 0x264   : > { %p1345_p9 = scmp.ge.s32.totalorder %s1021_s15, 2  ;;  %s597_s26 = scalar_lea.sflag [#allocation4], %s596_s17 }
 0x266   : > { %p815_p12 = pnand %p1345_p9, %p1344_p7 }
 0x268   : > { %1004 = dma.done.wait (!%p815_p12), %s597_s26, 2048  }
 0x269   : > { %1006 = vsyncadd (!%p815_p12), %s597_s26, 4294965248  ;;  %p17_p2 = scmp.ge.s32.totalorder %s1164_s4, 4   ;;  %s1346_s12 = smov %s1013_s13 }
 0x26a   : > { %s1347_s13 = smov %s1017_s14  ;;  %s1348_s14 = smov %s1180_s9 }
 0x26b   : > { %s1349_s15 = smov %s1164_s4  ;;  %19 = sbr.rel (!%p17_p2) target bundleno = 6 (0x6), region = 85 }
 0x272   :  { %602 = vsyncpa [#allocation3], 1 }
 0x273   :  { %604 = vsyncpa [#allocation3 + $0x1], 1 }
 0x274   :  { %605 = vsyncpa [#allocation6], 1 }
 0x275   :  { %606 = vsyncpa [#allocation4], 1 }
 0x276   :  { %608 = vsyncpa [#allocation4 + $0x1], 1 }

</bundles_post_ra>
